<compile_context>
chip_gen: v5e
topology: v5e:2x2
jax: 0.10.0
libtpu: 0.0.40
codegen_flags: <defaults>
</compile_context>

<pallas_src>
import functools

import jax
import jax.numpy as jnp
from jax.experimental import pallas as pl
from jax.experimental.pallas import tpu as pltpu


def _conv1d_lora_kernel(x_ref, a_ref, b_ref, w_ref, bias_ref, o_ref, *, scale):
    # x_ref:    (1, C_in,  TILE_L)  input tile
    # a_ref:    (1, r,     C_in)    per-batch LoRA A factor
    # b_ref:    (1, C_out, r)       per-batch LoRA B factor
    # w_ref:    (C_out, C_in)       frozen Conv1d(k=1) weight
    # bias_ref: (C_out, 1)          frozen Conv1d bias (f32, broadcasts over lanes)
    # o_ref:    (1, C_out, TILE_L)
    x = x_ref[0]                                                       # (C_in, TILE_L)

    # tiny merge on the MXU, f32 accumulate (recomputed each tile; ~free)
    ba = jnp.dot(b_ref[0], a_ref[0], preferred_element_type=jnp.float32)
    w_eff = w_ref[...].astype(jnp.float32) + scale * ba                # (C_out, C_in)

    # single matmul over the tile; MXU is fed in the input dtype (bf16 OK),
    # accumulation stays f32.
    out = jnp.dot(w_eff.astype(x.dtype), x, preferred_element_type=jnp.float32)
    o_ref[0] = (out + bias_ref[...]).astype(o_ref.dtype)


def _vmem_tile_budget_bytes():
    """Generation-aware budget for the double-buffered x+out tiles.

    Stays comfortably inside the smallest scoped-VMEM default (16 MiB on v5e,
    32 MiB on v6e/v7x) and v7x's 64 MiB physical VMEM, leaving headroom for the
    (double-buffered) W/A/B/bias blocks and compiler internal scratch.
    """
    try:
        cap = int(pltpu.get_tpu_info().vmem_capacity_bytes)
    except Exception:          # interpret mode / older jax: assume smallest (v7x)
        cap = 64 << 20
    return min(cap // 8, 12 << 20)


def _pick_tile_l(L, n_batch, c_in, c_out, x_itemsize, out_itemsize, budget):
    """Largest multiple-of-128 divisor of L whose double-buffered x+out tiles
    fit `budget`.  L must already be a multiple of 128 (wrapper pads).
    When n_batch == 1, prefer >=2 L tiles so both v7x TensorCores get work."""
    bytes_per_l = 2 * (c_in * x_itemsize + c_out * out_itemsize)   # 2x: double buffer

    def fits(t):
        return t * bytes_per_l <= budget

    min_tiles = 2 if n_batch == 1 else 1
    best_any = None
    for t in range(L, 0, -128):            # full L first, then smaller divisors
        if L % t != 0 or not fits(t):
            continue
        if L // t >= min_tiles:
            return t
        if best_any is None:
            best_any = t
    if best_any is not None:
        return best_any
    # Nothing fits the budget (very large channel counts): use a 128-lane tile;
    # the wrapper raises vmem_limit_bytes for this case.
    return min(L, 128)


def conv1d_lora_forward(x_ncl, A3, B3, weight, bias, *, scale, compute_dtype=None):
    """out = scale * B @ (A @ x) + conv1d_k1(x, W, bias);  x in NCL layout.

    Fused Pallas kernel for the kernel_size==1, groups==1, modes=None branch
    of Conv1dLoRA.forward.
    """
    N, C_in, L = x_ncl.shape
    C_out = weight.shape[0]
    r = A3.shape[1]

    w2d = weight.reshape(C_out, C_in)        # Conv1d (C_out, C_in, 1) -> (C_out, C_in)
    b2d = bias.reshape(C_out, 1).astype(jnp.float32)

    if compute_dtype is not None:            # HBM-bound: bf16 I/O ~2x on all gens
        x_ncl = x_ncl.astype(compute_dtype)
        A3 = A3.astype(compute_dtype)
        B3 = B3.astype(compute_dtype)
        w2d = w2d.astype(compute_dtype)

    out_dtype = x_ncl.dtype
    x_isz = x_ncl.dtype.itemsize
    o_isz = jnp.dtype(out_dtype).itemsize

    # lane-align L so every block is (.., k*128); padded tail sliced off below
    L_pad = -(-L // 128) * 128
    if L_pad != L:
        x_ncl = jnp.pad(x_ncl, ((0, 0), (0, 0), (0, L_pad - L)))

    budget = _vmem_tile_budget_bytes()
    tile_l = _pick_tile_l(L_pad, N, C_in, C_out, x_isz, o_isz, budget)
    grid = (N, pl.cdiv(L_pad, tile_l))

    # estimated VMEM footprint; only override the scoped limit when needed
    small = (C_out * C_in + r * C_in + C_out * r) * x_isz + C_out * 4
    est_vmem = 2 * tile_l * (C_in * x_isz + C_out * o_isz) + 2 * small
    cp_kwargs = dict(dimension_semantics=("parallel", "parallel"))
    if est_vmem > (12 << 20):
        cp_kwargs["vmem_limit_bytes"] = min(2 * est_vmem, 64 << 20)

    # scale is a fixed hyperparameter (alpha/r) -> baked as a compile-time
    # constant; pass via SMEM if it ever becomes traced/learned.
    kernel = functools.partial(_conv1d_lora_kernel, scale=float(scale))

    flops = 2 * N * C_out * C_in * L_pad + 2 * N * grid[1] * C_out * r * C_in
    bytes_accessed = (N * L_pad * (C_in * x_isz + C_out * o_isz)
                      + N * (r * C_in + C_out * r) * x_isz
                      + C_out * C_in * x_isz + C_out * 4)

    out = pl.pallas_call(
        kernel,
        out_shape=jax.ShapeDtypeStruct((N, C_out, L_pad), out_dtype),
        grid=grid,
        in_specs=[
            pl.BlockSpec((1, C_in, tile_l), lambda n, l: (n, 0, l)),   # X tile
            # W / bias / A / B blocks are tiny (<< the x/out tiles); default
            # double-buffering of them is negligible VMEM at these channel
            # counts -- revisit with pipeline_mode=pl.Buffered(1) only if
            # C_in/C_out grow enough to threaten v7x's 64 MiB VMEM.
            pl.BlockSpec((1, r, C_in), lambda n, l: (n, 0, 0)),        # A (per batch)
            pl.BlockSpec((1, C_out, r), lambda n, l: (n, 0, 0)),       # B (per batch)
            pl.BlockSpec((C_out, C_in), lambda n, l: (0, 0)),          # W (invariant)
            pl.BlockSpec((C_out, 1), lambda n, l: (0, 0)),             # bias (invariant)
        ],
        out_specs=pl.BlockSpec((1, C_out, tile_l), lambda n, l: (n, 0, l)),
        compiler_params=pltpu.CompilerParams(**cp_kwargs),
        cost_estimate=pl.CostEstimate(flops=int(flops), transcendentals=0,
                                      bytes_accessed=int(bytes_accessed)),
    )(x_ncl, A3, B3, w2d, b2d)

    return out[..., :L] if L_pad != L else out


def _embedding_mlp(x, p):
    # A_embedding / B_embedding head with n_layers=0 (the module's default):
    # nn.Linear -> nn.BatchNorm1d (eval: running stats) -> nn.GELU (exact) -> nn.Linear
    h = x @ p["w1"].T + p["b1"]
    h = (h - p["bn_mean"]) * jax.lax.rsqrt(p["bn_var"] + 1e-5) * p["bn_gamma"] + p["bn_beta"]
    h = jax.nn.gelu(h, approximate=False)
    return h @ p["w2"].T + p["b2"]


if __name__ == "__main__":
    key = jax.random.PRNGKey(0)
    keys = jax.random.split(key, 8)

    # small shapes consistent with Conv1dLoRA around Conv1d(C_in, C_out, k=1)
    N, C_in, C_out, L = 2, 32, 32, 384      # L = 3 * 128 -> full-L tile, grid (2, 1)
    r = 8
    alpha = r
    scale = alpha / r                        # default alpha=r -> scale = 1.0
    A_dim, B_dim, hidden = 16, 16, 32

    def init_mlp(k, d_in, d_hidden, d_out):
        ks = jax.random.split(k, 6)
        return {
            "w1": jax.random.normal(ks[0], (d_hidden, d_in), jnp.float32) * 0.1,
            "b1": jax.random.normal(ks[1], (d_hidden,), jnp.float32) * 0.1,
            "bn_gamma": jnp.ones((d_hidden,), jnp.float32),
            "bn_beta": jnp.zeros((d_hidden,), jnp.float32),
            "bn_mean": jax.random.normal(ks[2], (d_hidden,), jnp.float32) * 0.1,
            "bn_var": jnp.abs(jax.random.normal(ks[3], (d_hidden,), jnp.float32)) + 1.0,
            "w2": jax.random.normal(ks[4], (d_out, d_hidden), jnp.float32) * 0.1,
            "b2": jax.random.normal(ks[5], (d_out,), jnp.float32) * 0.1,
        }

    x = jax.random.normal(keys[0], (N, C_in, L), jnp.float32)
    A_cells = jax.random.normal(keys[1], (N, A_dim), jnp.float32)
    B_cells = jax.random.normal(keys[2], (N, B_dim), jnp.float32)
    weight = jax.random.normal(keys[3], (C_out, C_in, 1), jnp.float32) * 0.1   # Conv1d k=1
    bias = jax.random.normal(keys[4], (C_out,), jnp.float32) * 0.1
    a_params = init_mlp(keys[5], A_dim, hidden, C_in * r)
    b_params = init_mlp(keys[6], B_dim, hidden, C_out * r)

    # A/B embedding heads: tiny (batch, emb_dim) MLPs, negligible next to the
    # per-position conv work, so they run in plain JAX on the host graph.
    # TODO(synk): n_layers>0 residual embedding blocks, the `modes` filter
    # selection, and the kernel_size>1 / grouped-conv branch of
    # Conv1dLoRA.forward are not lowered to Pallas (default k=1, groups=1 path only).
    A3 = _embedding_mlp(A_cells, a_params).reshape(N, r, C_in)
    B3 = _embedding_mlp(B_cells, b_params).reshape(N, C_out, r)

    # plain-JAX reference mirroring the PyTorch forward (k=1, groups=1 branch)
    def reference(x_in):
        lora = jnp.einsum("nrc,ncl->nrl", A3, x_in)
        lora = jnp.einsum("nor,nrl->nol", B3, lora)
        base = (jnp.einsum("oc,ncl->nol", weight.reshape(C_out, C_in), x_in)
                + bias[None, :, None])
        return lora * scale + base

    # 1) f32, lane-aligned L -> exact (fp-assoc) match
    out = conv1d_lora_forward(x, A3, B3, weight, bias, scale=scale)
    out = jax.block_until_ready(out)
    ref = reference(x)
    assert out.shape == (N, C_out, L)
    err = float(jnp.max(jnp.abs(out - ref)))
    assert jnp.allclose(out, ref, atol=1e-4, rtol=1e-4), err

    # 2) non-128-multiple L -> exercises the budgeted pad-and-slice path
    L_odd = 200
    x_odd = x[..., :L_odd]
    out_odd = jax.block_until_ready(
        conv1d_lora_forward(x_odd, A3, B3, weight, bias, scale=scale))
    ref_odd = reference(x_odd)
    assert out_odd.shape == (N, C_out, L_odd)
    err_odd = float(jnp.max(jnp.abs(out_odd - ref_odd)))
    assert jnp.allclose(out_odd, ref_odd, atol=1e-4, rtol=1e-4), err_odd

    # 3) bf16 I/O with f32 accumulation (the HBM-bandwidth lever)
    out_bf16 = jax.block_until_ready(
        conv1d_lora_forward(x, A3, B3, weight, bias, scale=scale,
                            compute_dtype=jnp.bfloat16))
    assert out_bf16.dtype == jnp.bfloat16
    err_bf16 = float(jnp.max(jnp.abs(out_bf16.astype(jnp.float32) - ref)))
    assert err_bf16 < 0.15, err_bf16

    print("KERNEL_OK")
</pallas_src>

<mosaic_0001>
module attributes {stable_mosaic.version = 11 : i64} {
  func.func @_conv1d_lora_kernel(%arg0: i32, %arg1: i32, %arg2: memref<1x32x384xf32, #tpu.memory_space<vmem>>, %arg3: memref<1x8x32xf32, #tpu.memory_space<vmem>>, %arg4: memref<1x32x8xf32, #tpu.memory_space<vmem>>, %arg5: memref<32x32xf32, #tpu.memory_space<vmem>>, %arg6: memref<32x1xf32, #tpu.memory_space<vmem>>, %arg7: memref<1x32x384xf32, #tpu.memory_space<vmem>>) attributes {dimension_semantics = [#tpu.dimension_semantics<parallel>, #tpu.dimension_semantics<parallel>], iteration_bounds = array<i64: 2, 1>, scalar_prefetch = 0 : i64, scratch_operands = 0 : i64, tpu.core_type = #tpu.core_type<tc>, window_params = [{transform_indices = @transform_0, window_bounds = array<i64: 1, 32, 384>}, {transform_indices = @transform_1, window_bounds = array<i64: 1, 8, 32>}, {transform_indices = @transform_2, window_bounds = array<i64: 1, 32, 8>}, {pipeline_mode = #tpu.pipeline_mode<synchronous>, transform_indices = @transform_3, window_bounds = array<i64: 32, 32>}, {pipeline_mode = #tpu.pipeline_mode<synchronous>, transform_indices = @transform_4, window_bounds = array<i64: 32, 1>}, {transform_indices = @transform_5, window_bounds = array<i64: 1, 32, 384>}]} {
    %c0 = arith.constant 0 : index
    %c0_0 = arith.constant 0 : index
    %c0_1 = arith.constant 0 : index
    %0 = vector.load %arg2[%c0, %c0_0, %c0_1] : memref<1x32x384xf32, #tpu.memory_space<vmem>>, vector<1x32x384xf32>
    %1 = vector.shape_cast %0 : vector<1x32x384xf32> to vector<32x384xf32>
    %c0_2 = arith.constant 0 : index
    %c0_3 = arith.constant 0 : index
    %c0_4 = arith.constant 0 : index
    %2 = vector.load %arg4[%c0_2, %c0_3, %c0_4] : memref<1x32x8xf32, #tpu.memory_space<vmem>>, vector<1x32x8xf32>
    %3 = vector.shape_cast %2 : vector<1x32x8xf32> to vector<32x8xf32>
    %c0_5 = arith.constant 0 : index
    %c0_6 = arith.constant 0 : index
    %c0_7 = arith.constant 0 : index
    %4 = vector.load %arg3[%c0_5, %c0_6, %c0_7] : memref<1x8x32xf32, #tpu.memory_space<vmem>>, vector<1x8x32xf32>
    %5 = vector.shape_cast %4 : vector<1x8x32xf32> to vector<8x32xf32>
    %cst = arith.constant dense<0.000000e+00> : vector<32x32xf32>
    %6 = tpu.matmul %3, %5, %cst {dimension_numbers = #tpu.dot_dimension_numbers<[1], [0], [0], [1], [0, 0, 1, 1], [], []>} : vector<32x8xf32>, vector<8x32xf32>, vector<32x32xf32> -> vector<32x32xf32>
    %c0_8 = arith.constant 0 : index
    %c0_9 = arith.constant 0 : index
    %7 = vector.load %arg5[%c0_8, %c0_9] : memref<32x32xf32, #tpu.memory_space<vmem>>, vector<32x32xf32>
    %cst_10 = arith.constant 1.000000e+00 : f32
    %8 = vector.broadcast %cst_10 : f32 to vector<32x32xf32>
    %9 = arith.mulf %8, %6 : vector<32x32xf32>
    %10 = arith.addf %7, %9 : vector<32x32xf32>
    %cst_11 = arith.constant dense<0.000000e+00> : vector<32x384xf32>
    %11 = tpu.matmul %10, %1, %cst_11 {dimension_numbers = #tpu.dot_dimension_numbers<[1], [0], [0], [1], [0, 0, 1, 1], [], []>} : vector<32x32xf32>, vector<32x384xf32>, vector<32x384xf32> -> vector<32x384xf32>
    %c0_12 = arith.constant 0 : index
    %c0_13 = arith.constant 0 : index
    %12 = vector.load %arg6[%c0_12, %c0_13] : memref<32x1xf32, #tpu.memory_space<vmem>>, vector<32x1xf32>
    %13 = vector.broadcast %12 : vector<32x1xf32> to vector<32x384xf32>
    %14 = arith.addf %11, %13 : vector<32x384xf32>
    %c0_14 = arith.constant 0 : index
    %c0_15 = arith.constant 0 : index
    %c0_16 = arith.constant 0 : index
    %15 = vector.load %arg7[%c0_14, %c0_15, %c0_16] : memref<1x32x384xf32, #tpu.memory_space<vmem>>, vector<1x32x384xf32>
    %16 = vector.shape_cast %15 : vector<1x32x384xf32> to vector<32x384xf32>
    %17 = vector.shape_cast %14 : vector<32x384xf32> to vector<1x32x384xf32>
    tpu.vector_store %arg7[%c0_14, %c0_15, %c0_16], %17 {strides = array<i32>} : memref<1x32x384xf32, #tpu.memory_space<vmem>>, vector<1x32x384xf32>,
    return
  }
  func.func @transform_0(%arg0: i32, %arg1: i32) -> (i32, i32, i32) {
    %c0_i32 = arith.constant 0 : i32
    %c0_i32_0 = arith.constant 0 : i32
    return %arg0, %c0_i32, %arg1 : i32, i32, i32
  }
  func.func @transform_1(%arg0: i32, %arg1: i32) -> (i32, i32, i32) {
    %c0_i32 = arith.constant 0 : i32
    %c0_i32_0 = arith.constant 0 : i32
    %c0_i32_1 = arith.constant 0 : i32
    return %arg0, %c0_i32, %c0_i32_0 : i32, i32, i32
  }
  func.func @transform_2(%arg0: i32, %arg1: i32) -> (i32, i32, i32) {
    %c0_i32 = arith.constant 0 : i32
    %c0_i32_0 = arith.constant 0 : i32
    %c0_i32_1 = arith.constant 0 : i32
    return %arg0, %c0_i32, %c0_i32_0 : i32, i32, i32
  }
  func.func @transform_3(%arg0: i32, %arg1: i32) -> (i32, i32) {
    %c0_i32 = arith.constant 0 : i32
    %c0_i32_0 = arith.constant 0 : i32
    %c0_i32_1 = arith.constant 0 : i32
    return %c0_i32, %c0_i32_0 : i32, i32
  }
  func.func @transform_4(%arg0: i32, %arg1: i32) -> (i32, i32) {
    %c0_i32 = arith.constant 0 : i32
    %c0_i32_0 = arith.constant 0 : i32
    %c0_i32_1 = arith.constant 0 : i32
    return %c0_i32, %c0_i32_0 : i32, i32
  }
  func.func @transform_5(%arg0: i32, %arg1: i32) -> (i32, i32, i32) {
    %c0_i32 = arith.constant 0 : i32
    %c0_i32_0 = arith.constant 0 : i32
    return %arg0, %c0_i32, %arg1 : i32, i32, i32
  }
}

</mosaic_0001>

<bundles_post_ra>
// kernel: tpu_custom_call.1
= control target key start
LH: loop header
LB: loop body
LE: loop exit
PB: predicated region body
PF: predicated region fallthrough
CT: control target
= control target key end

     0   :  { %10 = vsyncpa [#allocation3], 0  ;;  %s1086_s0 = inlined_call_operand.hbm [shape: f32[2,32,384], index: 0, kind: input, shape index: {}]   ;;  %s1087_s1 = inlined_call_operand.vmem [shape: f32[2,8,32], index: 1, kind: input, shape index: {}]   ;;  %s1088_s2 = inlined_call_operand.vmem [shape: f32[2,32,8], index: 2, kind: input, shape index: {}]   ;;  %s1089_s3 = inlined_call_operand.vmem [shape: f32[32,32], index: 3, kind: input, shape index: {}]   ;;  %s1090_s4 = inlined_call_operand.vmem [shape: f32[32,1], index: 4, kind: input, shape index: {}]   ;;  %s1091_s5 = inlined_call_operand.hbm [shape: f32[2,32,384], index: 5, kind: output, shape index: {}]  }
   0x1   :  { %12 = vsyncpa [#allocation3 + $0x1], 0 }
   0x2   :  { %13 = vsyncpa [#allocation4], 0 }
   0x3   :  { %15 = vsyncpa [#allocation4 + $0x1], 0  ;;  %s885_s18 = smov 0   ;;  %s887_s19 = smov 0  }
   0x4   :  { %s889_s20 = smov 0   ;;  %s891_s21 = smov 0  }
   0x5   :  { %s893_s22 = smov 0   ;;  %s895_s23 = smov 0  }
   0x6 LB: > { %s634_s24 = sadd.s32 4294967295, %s848_s23   ;;  %s635_s25 = sadd.s32 4294967294, %s848_s23   ;;  %s848_s23 = sphi %s895_s23, %s21_s23   ;;  %s844_s22 = sphi %s893_s22, %s1100_s22   ;;  %s840_s21 = sphi %s891_s21, %s1099_s21   ;;  %s836_s20 = sphi %s889_s20, %s1098_s20   ;;  %s832_s19 = sphi %s887_s19, %s1097_s19   ;;  %s828_s18 = sphi %s885_s18, %s1096_s18  }
   0x7   : > { %s33_s26 = sadd.s32 1, %s844_s22  ;;  %s42_s27 = sadd.s32 1, %s836_s20 }
   0x8   : > { %p35_p0 = scmp.ge.s32.totalorder %s33_s26, 2  ;;  %p49_p1 = scmp.ne.s32.totalorder %s836_s20, %s832_s19 }
   0x9   : > { %p50_p2 = scmp.eq.s32.totalorder %s848_s23, 0  ;;  %p55_p3 = scmp.ne.s32.totalorder %s832_s19, %s828_s18 }
   0xa   : > { %s1102_s26 = smov (%p35_p0, %s33_s26), 0  ;;  %p56_p5 = scmp.eq.s32.totalorder %s634_s24, 0 }
   0xb   : > { %p926_p4 = por %p50_p2, %p49_p1  ;;  %s37_s29 = ssub.s32 %s844_s22, %s1102_s26 }
   0xc   : > { %p175_p6 = scmp.eq.s32.totalorder %s634_s24, 1  ;;  %p40_p7 = scmp.eq.s32.totalorder %s37_s29, 0 }
   0xd   : > { %p932_p8 = por %p56_p5, %p55_p3  ;;  %p181_p10 = scmp.eq.s32.totalorder %s635_s25, 1 }
   0xe   : > { %p936_p9 = por %p175_p6, %p49_p1  ;;  %p637_p12 = scmp.ge.s32.totalorder %s848_s23, 2 }
   0xf   : > { %s941_s7 = scalar_select %p40_p7, %s836_s20, %s42_s27  }
  0x10   : > { %p943_p11 = por %p181_p10, %p55_p3  ;;  %p679_p13 = scmp.lt.s32.totalorder %s848_s23, 2 }
  0x11   : > { %s207_s9 = sand.u32 1, %s836_s20   ;;  %s664_s11 = smul.u32 96, %s844_s22 }
  0x12   : > { %s663_s10 = smul.u32 96, %s207_s9  ;;  %p672_p0 = pnand %p679_p13, %p926_p4 }
  0x13   : > { %s218_s14 = scalar_lea.hbm %s1086_s0, %s664_s11  ;;  %p639_p1 = scmp.ge.s32.totalorder %s848_s23, 1 }
  0x14   : > { %s211_s15 = scalar_lea.vmem [#allocation2], %s663_s10  ;;  %s219_s17 = sshll.u32 %s218_s14, 4  ;;  %s220_s17 = int_to_ptr.hbm [resolvable:$true] %s219_s17 }
  0x15   : > { %s221_s16 = sshll.u32 %s211_s15, 4  ;;  %s208_s24 = scalar_lea.sflag [#allocation3], %s207_s9  ;;  %s222_s16 = int_to_ptr.vmem [resolvable:$true] %s221_s16 }
  0x16   : > { %s850_s25 = smov 384   ;;  %s851_s27 = smov 24  }
  0x17   : > { %674 = dma.hbm_to_vmem [thread:$0]  (!%p672_p0), %s220_s17, 1536, %s222_s16, %s208_s24, %s850_s25, %s850_s25, %s851_s27  }
  0x18   : > { %p244_p2 = scmp.lt.s32.totalorder %s848_s23, 3 }
  0x1a   : > { %p245_p3 = pnand %p639_p1, %p244_p2 }
  0x1b   : > { %s959_s28 = sand.u32 (!%p245_p3), 1, %s832_s19  }
  0x1c   : > { %248 = sbr.rel (%p245_p3) target bundleno = 333 (0x14d), region = 40  ;;  %s251_s10 = scalar_lea.sflag (!%p245_p3), [#allocation3], %s959_s28 }
  0x1d   : > { %s665_s29 = smul.u32 (!%p245_p3), 96, %s959_s28 }
  0x1f   : > { %s965_s11 = scalar_lea.vmem (!%p245_p3), [#allocation2], %s665_s29 }
  0x21   : > { %819 = dma.done.wait (%p932_p8), %s251_s10, 1536  }
  0x22   : > { %821 = vsyncadd (%p932_p8), %s251_s10, 4294965760  ;;  %p292_p4 = scmp.lt.s32.totalorder %s840_s21, 1  ;;  %vm319_vm0 = vcmask 64512   ;;  %v311_v2 = vld [vmem:[%s965_s11 + $0x48] sm:$0xff]  ;;  %v312_v3 = vld [vmem:[%s965_s11 + $0x50] sm:$0xff]  ;;  %v852_v18 = vmov 0  }
  0x23   : > { %418 = vmatpush.msra.mxu1 %v311_v2  ;;  %v313_v4 = vld [vmem:[%s965_s11 + $0x58] sm:$0xff]  ;;  %v308_v5 = vld [vmem:[%s965_s11 + $0x30] sm:$0xff]  ;;  %447 = vmatpush.msra.mxu2 %v312_v3  ;;  %v310_v7 = vld [vmem:[%s965_s11 + $0x40] sm:$0xff]  ;;  %vm393_vm1 = vcmask 261120   ;;  %s506_s15 = scalar_lea.sflag [#allocation4], %s959_s28  ;;  %s786_s25 = scalar_lea.hbm %s1091_s5, 192 }
  0x24   : > { %s293_s9 = scalar_select %p292_p4, %s840_s21, 1  ;;  %476 = vmatpush.msra.mxu3 %v313_v4  ;;  %v309_v6 = vld [vmem:[%s965_s11 + $0x38] sm:$0xff]  ;;  %v306_v12 = vld [vmem:[%s965_s11 + $0x20] sm:$0xff]  ;;  %v307_v13 = vld [vmem:[%s965_s11 + $0x28] sm:$0xff]  ;;  %734 = vset.pattern.permute.xlu0 %v852_v18 }
  0x25   : > { %419 = vmatpush.msra.mxu1 %v308_v5  ;;  %448 = vmatpush.msra.mxu2 %v309_v6  ;;  %v305_v11 = vld [vmem:[%s965_s11 + $0x18] sm:$0xff]  ;;  %v302_v14 = vld [vmem:[%s965_s11] sm:$0xff]  ;;  %v303_v15 = vld [vmem:[%s965_s11 + $0x8] sm:$0xff] }
  0x26   : > { %s640_s12 = sshll.u32 %s293_s9, 3  ;;  %s662_s13 = sshll.u32 %s293_s9, 5  ;;  %477 = vmatpush.msra.mxu3 %v310_v7  ;;  %v304_v16 = vld [vmem:[%s965_s11 + $0x10] sm:$0xff]  ;;  %v369_v17 = vld [vmem:[%s1090_s4] sm:$0xff]  ;;  %735 = vset.pattern.permute.xlu1 %v852_v18  ;;  %v370_v19 = vld [vmem:[%s1090_s4 + $0x8] sm:$0xff] }
  0x27   : > { %s295_s16 = scalar_lea.vmem %s1087_s1, %s640_s12  ;;  %s300_s30 = scalar_lea.vmem %s1088_s2, %s662_s13  ;;  %420 = vmatpush.msra.mxu1 %v305_v11  ;;  %449 = vmatpush.msra.mxu2 %v306_v12  ;;  %v371_v20 = vld [vmem:[%s1090_s4 + $0x10] sm:$0xff]  ;;  %v361_v21 = vld [vmem:[%s1089_s3] sm:$0xff]  ;;  %v372_v24 = vld [vmem:[%s1090_s4 + $0x18] sm:$0xff] }
  0x28   : > { %v318_v0 = vld [vmem:[%s295_s16] sm:$0xff]  ;;  %v315_v8 = vld [vmem:[%s300_s30 + $0x8] sm:$0xff]  ;;  %v316_v9 = vld [vmem:[%s300_s30 + $0x10] sm:$0xff]  ;;  %478 = vmatpush.msra.mxu3 %v307_v13  ;;  %375 = vperm.xlu0 %734, %v369_v17   ;;  %s1033_s9 = scalar_lea.vmem [#allocation5], %s665_s29  ;;  %s666_s29 = smul.u32 96, %s840_s21 }
  0x29   : > { %v314_v1 = vld [vmem:[%s300_s30] sm:$0xff]  ;;  %347 = vmatpush.msra.mxu0 %v318_v0  ;;  %v317_v10 = vld [vmem:[%s300_s30 + $0x18] sm:$0xff]  ;;  %421 = vmatpush.msra.mxu1 %v302_v14  ;;  %v362_v25 = vld [vmem:[%s1089_s3 + $0x8] sm:$0xff]  ;;  %s520_s14 = sshll.u32 %s1033_s9, 4  ;;  %s521_s14 = int_to_ptr.vmem [resolvable:$true] %s520_s14 }
  0x2a   : > { %643 = vmatmul.msk.f32.vlgmr.msra.gmra.mxu0 %vm319_vm0, %v314_v1  ;;  %450 = vmatpush.msra.mxu2 %v303_v15  ;;  %v363_v28 = vld [vmem:[%s1089_s3 + $0x10] sm:$0xff]  ;;  %v364_v31 = vld [vmem:[%s1089_s3 + $0x18] sm:$0xff]  ;;  %s519_s11 = scalar_lea.hbm %s1091_s5, %s666_s29 }
  0x2b   : > { %479 = vmatpush.msra.mxu3 %v304_v16  ;;  %385 = vperm.xlu1 %735, %v371_v20   ;;  %s522_s21 = sshll.u32 %s519_s11, 4  ;;  %s523_s21 = int_to_ptr.hbm [resolvable:$true] %s522_s21 }
  0x2c   : > { %s780_s16 = sshra.s32 %s523_s21, 4  ;;  %s781_s16 = int_to_ptr.hbm [resolvable:$true] %s780_s16 }
  0x2d   : > { %s782_s17 = scalar_lea.hbm %s781_s16, 96  ;;  %p787_p8 = scmp.lt.s32.totalorder %s781_s16, %s1091_s5 }
  0x2e   : > { %p783_p5 = scmp.ne.s32.totalorder %s781_s16, %s782_s17  ;;  %p788_p10 = scmp.lt.s32.totalorder %s786_s25, %s782_s17 }
  0x30   : > { %380 = vperm.xlu0 %734, %v370_v19   ;;  %p784_p6 = pnand %p783_p5, %p936_p9  ;;  %p789_p13 = por %p788_p10, %p787_p8 }
  0x32   : > { %644 = vmatmul.msk.f32.gmra.mxu0 %vm319_vm0, %v315_v8  ;;  %p785_p7 = pneg %p784_p6 }
  0x33   : > { %390 = vperm.xlu1 %735, %v372_v24  }
  0x34   : > { %p790_p0 = pnand %p789_p13, %p785_p7 }
  0x3a   : > { %645 = vmatmul.msk.f32.gmra.mxu0 %vm319_vm0, %v316_v9 }
  0x42   : > { %646 = vmatmul.msk.f32.gmra.mxu0 %vm319_vm0, %v317_v10 }
  0x9a   : > { %v376_v34 = vpop.permute.xlu0 %375 }
  0x9d   : > { %v386_v44 = vpop.permute.xlu1 %385 }
  0xa2   : > { %v381_v38 = vpop.permute.xlu0 %380 }
  0xa5   : > { %v391_v54 = vpop.permute.xlu1 %390 }
  0xa7   : > { %v349_v22 = vpop.f32.mrf.mxu0 }
  0xa8   : > { %v365_v23 = vadd.f32 %v361_v21, %v349_v22 }
  0xaa   : > { %647 = vmatmul.msk.f32.vlgmr.msra.gmra.mxu1 %vm393_vm1, %v365_v23  ;;  %651 = vmatmul.msk.f32.vlgmr.msra.gmra.mxu2 %vm393_vm1, %v365_v23 }
  0xab   : > { %655 = vmatmul.msk.f32.vlgmr.msra.gmra.mxu3 %vm393_vm1, %v365_v23 }
  0xaf   : > { %v352_v26 = vpop.f32.mrf.mxu0 }
  0xb0   : > { %v366_v27 = vadd.f32 %v362_v25, %v352_v26 }
  0xb2   : > { %648 = vmatmul.msk.f32.gmra.mxu1 %vm393_vm1, %v366_v27  ;;  %652 = vmatmul.msk.f32.gmra.mxu2 %vm393_vm1, %v366_v27 }
  0xb3   : > { %656 = vmatmul.msk.f32.gmra.mxu3 %vm393_vm1, %v366_v27 }
  0xb7   : > { %v355_v29 = vpop.f32.mrf.mxu0 }
  0xb8   : > { %v367_v30 = vadd.f32 %v363_v28, %v355_v29 }
  0xba   : > { %649 = vmatmul.msk.f32.gmra.mxu1 %vm393_vm1, %v367_v30  ;;  %653 = vmatmul.msk.f32.gmra.mxu2 %vm393_vm1, %v367_v30 }
  0xbb   : > { %657 = vmatmul.msk.f32.gmra.mxu3 %vm393_vm1, %v367_v30 }
  0xbf   : > { %v358_v32 = vpop.f32.mrf.mxu0 }
  0xc0   : > { %v368_v33 = vadd.f32 %v364_v31, %v358_v32 }
  0xc2   : > { %650 = vmatmul.msk.f32.gmra.mxu1 %vm393_vm1, %v368_v33  ;;  %654 = vmatmul.msk.f32.gmra.mxu2 %vm393_vm1, %v368_v33 }
  0xc3   : > { %658 = vmatmul.msk.f32.gmra.mxu3 %vm393_vm1, %v368_v33 }
 0x127   : > { %v423_v35 = vpop.f32.mrf.mxu1 }
 0x128   : > { %v424_v36 = vadd.f32 %v423_v35, %v376_v34 }
 0x12a   : > { %493 = vst [vmem:[%s1033_s9] sm:$0xff] %v424_v36 }
 0x12d   : > { %v452_v37 = vpop.f32.mrf.mxu2 }
 0x12e   : > { %v453_v39 = vadd.f32 %v452_v37, %v376_v34  ;;  %v481_v40 = vpop.f32.mrf.mxu3 }
 0x12f   : > { %v482_v41 = vadd.f32 %v481_v40, %v376_v34  ;;  %v426_v42 = vpop.f32.mrf.mxu1 }
 0x130   : > { %494 = vst [vmem:[%s1033_s9 + $0x8] sm:$0xff] %v453_v39  ;;  %v427_v43 = vadd.f32 %v426_v42, %v381_v38 }
 0x131   : > { %495 = vst [vmem:[%s1033_s9 + $0x10] sm:$0xff] %v482_v41 }
 0x132   : > { %496 = vst [vmem:[%s1033_s9 + $0x18] sm:$0xff] %v427_v43 }
 0x135   : > { %v455_v45 = vpop.f32.mrf.mxu2 }
 0x136   : > { %v456_v46 = vadd.f32 %v455_v45, %v381_v38  ;;  %v484_v47 = vpop.f32.mrf.mxu3 }
 0x137   : > { %v485_v48 = vadd.f32 %v484_v47, %v381_v38  ;;  %v429_v49 = vpop.f32.mrf.mxu1 }
 0x138   : > { %497 = vst [vmem:[%s1033_s9 + $0x20] sm:$0xff] %v456_v46  ;;  %v430_v50 = vadd.f32 %v429_v49, %v386_v44 }
 0x139   : > { %498 = vst [vmem:[%s1033_s9 + $0x28] sm:$0xff] %v485_v48 }
 0x13a   : > { %499 = vst [vmem:[%s1033_s9 + $0x30] sm:$0xff] %v430_v50 }
 0x13d   : > { %v458_v51 = vpop.f32.mrf.mxu2 }
 0x13e   : > { %v459_v52 = vadd.f32 %v458_v51, %v386_v44  ;;  %v487_v53 = vpop.f32.mrf.mxu3 }
 0x13f   : > { %v488_v55 = vadd.f32 %v487_v53, %v386_v44  ;;  %v432_v56 = vpop.f32.mrf.mxu1 }
 0x140   : > { %500 = vst [vmem:[%s1033_s9 + $0x38] sm:$0xff] %v459_v52  ;;  %v433_v57 = vadd.f32 %v432_v56, %v391_v54 }
 0x141   : > { %501 = vst [vmem:[%s1033_s9 + $0x40] sm:$0xff] %v488_v55 }
 0x142   : > { %502 = vst [vmem:[%s1033_s9 + $0x48] sm:$0xff] %v433_v57 }
 0x145   : > { %v461_v58 = vpop.f32.mrf.mxu2 }
 0x146   : > { %v462_v59 = vadd.f32 %v461_v58, %v391_v54  ;;  %v490_v60 = vpop.f32.mrf.mxu3 }
 0x147   : > { %v491_v61 = vadd.f32 %v490_v60, %v391_v54 }
 0x148   : > { %503 = vst [vmem:[%s1033_s9 + $0x50] sm:$0xff] %v462_v59 }
 0x149   : > { %504 = vst [vmem:[%s1033_s9 + $0x58] sm:$0xff] %v491_v61 }
 0x14a   : > { %793 = shalt.err (!%p790_p0)
}
 0x14b   : > { %s853_s28 = smov 384   ;;  %s854_s9 = smov 24  }
 0x14c   : > { %669 = dma.vmem_to_hbm [thread:$0]  (%p936_p9), %s521_s14, 1536, %s523_s21, %s506_s15, %s853_s28, %s853_s28, %s854_s9  }
 0x14d PF: > { %s537_s29 = sand.u32 1, %s828_s18   ;;  %p676_p1 = pnand %p637_p12, %p943_p11 }
 0x14e   : > { %s538_s12 = scalar_lea.sflag [#allocation4], %s537_s29 }
 0x14f   : > { %p677_p2 = pneg %p676_p1 }
 0x151   : > { %823 = dma.done.wait (%p677_p2), %s538_s12, 1536  }
 0x152   : > { %825 = vsyncadd (%p677_p2), %s538_s12, 4294965760  ;;  %s21_s23 = sadd.s32 1, %s848_s23   ;;  %s1096_s18 = smov %s832_s19 }
 0x153   : > { %p18_p3 = scmp.ge.s32.totalorder %s21_s23, 4   ;;  %s1097_s19 = smov %s836_s20 }
 0x154   : > { %s1098_s20 = smov %s941_s7  ;;  %s1099_s21 = smov %s844_s22 }
 0x155   : > { %s1100_s22 = smov %s1102_s26  ;;  %20 = sbr.rel (!%p18_p3) target bundleno = 6 (0x6), region = 91 }
 0x15a   :  { %544 = vsyncpa [#allocation3], 1 }
 0x15b   :  { %546 = vsyncpa [#allocation3 + $0x1], 1 }
 0x15c   :  { %547 = vsyncpa [#allocation4], 1 }
 0x15d   :  { %549 = vsyncpa [#allocation4 + $0x1], 1 }

</bundles_post_ra>
